<compile_context>
chip_gen: v7x
topology: tpu7x:2x2x1
jax: 0.10.0
libtpu: 0.0.40
codegen_flags: <defaults>
</compile_context>

<pallas_src>
import functools

import jax
import jax.numpy as jnp
from jax.experimental import pallas as pl
from jax.experimental.pallas import tpu as pltpu


def msnn_kernel(x_ref, w1_ref, b1_ref, w2_ref, b2_ref, wcls_ref, bcls_ref,
                out_ref):
    # Layer 1 (both pathways at once via block-diagonal W1).
    h = jnp.dot(x_ref[...], w1_ref[...], preferred_element_type=jnp.float32)
    h = jnp.maximum(h + b1_ref[...], 0.0).astype(w2_ref.dtype)

    # Layer 2 (block-diagonal, alpha/beta folded into weights/biases).
    h = jnp.dot(h, w2_ref[...], preferred_element_type=jnp.float32)
    h = jnp.maximum(h + b2_ref[...], 0.0).astype(wcls_ref.dtype)

    # Stacked classifier: h @ vstack(Wcls, Wcls) == (hc + hb) @ Wcls.
    out_ref[...] = (jnp.dot(h, wcls_ref[...],
                            preferred_element_type=jnp.float32)
                    + bcls_ref[...]).astype(out_ref.dtype)


def simple_msnn_forward(x, params, *, tile_b=None, use_bf16=False):
    """x: (B, 4, H, W) float32, NCHW. Returns (B, num_classes) float32."""
    B, C, H, W = x.shape
    in_features = C * H * W
    color_size = 3 * H * W

    hidden = params["w1c"].shape[1]
    two_h = 2 * hidden
    num_classes = params["wcls"].shape[1]
    ncls_pad = pl.cdiv(num_classes, 128) * 128

    compute_dtype = jnp.bfloat16 if use_bf16 else jnp.float32

    # ---- weight prep (runs once in XLA, outside the kernel) ----------------
    alpha_reg = jnp.maximum(params["alpha"][0], 0.01)
    beta_reg = jnp.maximum(params["beta"][0], 0.01)

    # Block-diagonal layer 1: x rows are [color(3HW) | brightness(HW)] because
    # NCHW.reshape(B,-1) keeps channel-major order, matching PyTorch .view().
    w1 = jnp.zeros((in_features, two_h), jnp.float32)
    w1 = w1.at[:color_size, :hidden].set(params["w1c"])
    w1 = w1.at[color_size:, hidden:].set(params["w1b"])
    b1 = jnp.concatenate([params["b1c"], params["b1b"]], axis=1)   # (1, 2H)

    # Block-diagonal layer 2 with alpha/beta folded in (exact through ReLU).
    w2 = jnp.zeros((two_h, two_h), jnp.float32)
    w2 = w2.at[:hidden, :hidden].set(params["w2c"] * alpha_reg)
    w2 = w2.at[hidden:, hidden:].set(params["w2b"] * beta_reg)
    b2 = jnp.concatenate([params["b2c"] * alpha_reg,
                          params["b2b"] * beta_reg], axis=1)        # (1, 2H)

    # Stacked + lane-padded classifier (128-wide output -> unmasked stores).
    wcls = jnp.zeros((two_h, ncls_pad), jnp.float32)
    wcls = wcls.at[:hidden, :num_classes].set(params["wcls"])
    wcls = wcls.at[hidden:, :num_classes].set(params["wcls"])
    bcls = jnp.zeros((1, ncls_pad), jnp.float32).at[:, :num_classes].set(
        params["bcls"])

    w1 = w1.astype(compute_dtype)
    w2 = w2.astype(compute_dtype)
    wcls = wcls.astype(compute_dtype)

    # Single flattened input stream; one DMA stream, no pre-kernel copies.
    x_flat = x.reshape(B, in_features).astype(compute_dtype)

    # ---- batch tiling -------------------------------------------------------
    if tile_b is None:
        # Big tiles amortize grid-step overhead and hit the HBM roofline;
        # capped at 1024 (double-buffered x tile <= 8 MiB f32).
        tile_b = min(1024, pl.cdiv(B, 8) * 8)
        # v7x megacore: keep >= 2 grid steps when the batch allows it.
        if B >= 16 and pl.cdiv(B, tile_b) < 2:
            tile_b = pl.cdiv(pl.cdiv(B, 2), 8) * 8
    b_pad = pl.cdiv(B, tile_b) * tile_b
    if b_pad != B:
        x_flat = jnp.pad(x_flat, ((0, b_pad - B), (0, 0)))

    # ---- VMEM budget / cost estimate ---------------------------------------
    x_bytes = x_flat.dtype.itemsize
    weight_bytes = sum(a.size * a.dtype.itemsize
                       for a in (w1, b1, w2, b2, wcls, bcls))
    vmem_need = (2 * tile_b * in_features * x_bytes      # x, double-buffered
                 + 2 * tile_b * ncls_pad * 4             # out, double-buffered
                 + 2 * weight_bytes                      # resident weights
                 + 4 * tile_b * two_h * 4                # activation temps
                 + (4 << 20))                            # headroom
    vmem_limit = int(min(max(vmem_need, 16 << 20), 56 << 20))  # < v7x 64 MiB

    flops = 2 * b_pad * (in_features * two_h + two_h * two_h + two_h * ncls_pad)
    bytes_accessed = (b_pad * in_features * x_bytes
                      + b_pad * ncls_pad * 4 + weight_bytes)

    def resident(arr):
        # Constant block index -> weights/biases stay resident in VMEM.
        return pl.BlockSpec(arr.shape, lambda i: (0, 0))

    out = pl.pallas_call(
        msnn_kernel,
        out_shape=jax.ShapeDtypeStruct((b_pad, ncls_pad), jnp.float32),
        grid=(b_pad // tile_b,),
        in_specs=[
            pl.BlockSpec((tile_b, in_features), lambda i: (i, 0)),  # x tile
            resident(w1), resident(b1),
            resident(w2), resident(b2),
            resident(wcls), resident(bcls),
        ],
        out_specs=pl.BlockSpec((tile_b, ncls_pad), lambda i: (i, 0)),
        compiler_params=pltpu.CompilerParams(
            dimension_semantics=("parallel",),     # shard batch over TCs (v7x)
            vmem_limit_bytes=vmem_limit),
        cost_estimate=pl.CostEstimate(flops=flops, transcendentals=0,
                                      bytes_accessed=bytes_accessed),
    )(x_flat, w1, b1, w2, b2, wcls, bcls)

    return out[:B, :num_classes]


def init_params(key, input_size=(4, 16, 16), hidden_size=128, num_classes=10):
    """Deterministic init mimicking PyTorch Linear default U(-1/sqrt(fan_in), ...)."""
    c, h, w = input_size
    color_size = 3 * h * w
    brightness_size = 1 * h * w

    def linear(k, fan_in, fan_out):
        kw, kb = jax.random.split(k)
        bound = 1.0 / jnp.sqrt(fan_in)
        W = jax.random.uniform(kw, (fan_in, fan_out), jnp.float32, -bound, bound)
        b = jax.random.uniform(kb, (1, fan_out), jnp.float32, -bound, bound)
        return W, b

    ks = jax.random.split(key, 5)
    w1c, b1c = linear(ks[0], color_size, hidden_size)
    w2c, b2c = linear(ks[1], hidden_size, hidden_size)
    w1b, b1b = linear(ks[2], brightness_size, hidden_size)
    w2b, b2b = linear(ks[3], hidden_size, hidden_size)
    wcls, bcls = linear(ks[4], hidden_size, num_classes)

    return dict(
        w1c=w1c, b1c=b1c, w2c=w2c, b2c=b2c,
        w1b=w1b, b1b=b1b, w2b=w2b, b2b=b2b,
        wcls=wcls, bcls=bcls,
        alpha=jnp.array([1.0], jnp.float32),
        beta=jnp.array([1.0], jnp.float32),
    )


def reference_forward(x, params):
    """Pure-JAX reference mirroring the PyTorch forward literally."""
    B = x.shape[0]
    color = x[:, :3, :, :].reshape(B, -1)
    bright = x[:, 3:4, :, :].reshape(B, -1)
    hc = jnp.maximum(color @ params["w1c"] + params["b1c"], 0.0)
    hc = jnp.maximum(hc @ params["w2c"] + params["b2c"], 0.0)
    hb = jnp.maximum(bright @ params["w1b"] + params["b1b"], 0.0)
    hb = jnp.maximum(hb @ params["w2b"] + params["b2b"], 0.0)
    a = jnp.maximum(params["alpha"][0], 0.01)
    b = jnp.maximum(params["beta"][0], 0.01)
    feat = a * hc + b * hb
    return feat @ params["wcls"] + params["bcls"]


if __name__ == "__main__":
    key = jax.random.PRNGKey(0)
    k_x, k_x2, k_p = jax.random.split(key, 3)

    C, H, W = 4, 16, 16
    hidden_size, num_classes = 128, 10
    params = init_params(k_p, input_size=(C, H, W),
                         hidden_size=hidden_size, num_classes=num_classes)

    fwd = jax.jit(simple_msnn_forward)

    # Small batch (single grid step).
    x = jax.random.normal(k_x, (2, C, H, W), jnp.float32)
    out = jax.block_until_ready(fwd(x, params))
    ref = reference_forward(x, params)
    assert out.shape == (2, num_classes)
    assert jnp.allclose(out, ref, atol=1e-4, rtol=1e-4), float(
        jnp.max(jnp.abs(out - ref)))

    # Larger ragged batch -> batch padding + multi-step grid (megacore path).
    x_big = jax.random.normal(k_x2, (40, C, H, W), jnp.float32)
    out_big = jax.block_until_ready(fwd(x_big, params))
    ref_big = reference_forward(x_big, params)
    assert out_big.shape == (40, num_classes)
    assert jnp.allclose(out_big, ref_big, atol=1e-4, rtol=1e-4), float(
        jnp.max(jnp.abs(out_big - ref_big)))

    # bf16 fast path (bf16 operands, f32 accumulation) -> looser tolerance.
    fwd_bf16 = jax.jit(functools.partial(simple_msnn_forward, use_bf16=True))
    out_bf16 = jax.block_until_ready(fwd_bf16(x_big, params))
    rel_err = float(jnp.max(jnp.abs(out_bf16 - ref_big))
                    / (jnp.max(jnp.abs(ref_big)) + 1e-6))
    assert rel_err < 0.1, rel_err

    print("KERNEL_OK")
</pallas_src>

<mosaic_0001>
module attributes {stable_mosaic.version = 11 : i64} {
  func.func @msnn_kernel(%arg0: i32, %arg1: memref<8x1024xf32, #tpu.memory_space<vmem>>, %arg2: memref<1024x256xf32, #tpu.memory_space<vmem>>, %arg3: memref<1x256xf32, #tpu.memory_space<vmem>>, %arg4: memref<256x256xf32, #tpu.memory_space<vmem>>, %arg5: memref<1x256xf32, #tpu.memory_space<vmem>>, %arg6: memref<256x128xf32, #tpu.memory_space<vmem>>, %arg7: memref<1x128xf32, #tpu.memory_space<vmem>>, %arg8: memref<8x128xf32, #tpu.memory_space<vmem>>) attributes {dimension_semantics = [#tpu.dimension_semantics<parallel>], iteration_bounds = array<i64: 1>, scalar_prefetch = 0 : i64, scratch_operands = 0 : i64, tpu.core_type = #tpu.core_type<tc>, window_params = [{transform_indices = @transform_0, window_bounds = array<i64: 8, 1024>}, {pipeline_mode = #tpu.pipeline_mode<synchronous>, transform_indices = @transform_1, window_bounds = array<i64: 1024, 256>}, {pipeline_mode = #tpu.pipeline_mode<synchronous>, transform_indices = @transform_2, window_bounds = array<i64: 1, 256>}, {pipeline_mode = #tpu.pipeline_mode<synchronous>, transform_indices = @transform_3, window_bounds = array<i64: 256, 256>}, {pipeline_mode = #tpu.pipeline_mode<synchronous>, transform_indices = @transform_4, window_bounds = array<i64: 1, 256>}, {pipeline_mode = #tpu.pipeline_mode<synchronous>, transform_indices = @transform_5, window_bounds = array<i64: 256, 128>}, {pipeline_mode = #tpu.pipeline_mode<synchronous>, transform_indices = @transform_6, window_bounds = array<i64: 1, 128>}, {transform_indices = @transform_7, window_bounds = array<i64: 8, 128>}]} {
    %c0 = arith.constant 0 : index
    %c0_0 = arith.constant 0 : index
    %0 = vector.load %arg1[%c0, %c0_0] : memref<8x1024xf32, #tpu.memory_space<vmem>>, vector<8x1024xf32>
    %c0_1 = arith.constant 0 : index
    %c0_2 = arith.constant 0 : index
    %1 = vector.load %arg2[%c0_1, %c0_2] : memref<1024x256xf32, #tpu.memory_space<vmem>>, vector<1024x256xf32>
    %cst = arith.constant dense<0.000000e+00> : vector<8x256xf32>
    %2 = tpu.matmul %0, %1, %cst {dimension_numbers = #tpu.dot_dimension_numbers<[1], [0], [0], [1], [0, 0, 1, 1], [], []>} : vector<8x1024xf32>, vector<1024x256xf32>, vector<8x256xf32> -> vector<8x256xf32>
    %c0_3 = arith.constant 0 : index
    %c0_4 = arith.constant 0 : index
    %3 = vector.load %arg3[%c0_3, %c0_4] : memref<1x256xf32, #tpu.memory_space<vmem>>, vector<1x256xf32>
    %4 = vector.broadcast %3 : vector<1x256xf32> to vector<8x256xf32>
    %5 = arith.addf %2, %4 : vector<8x256xf32>
    %cst_5 = arith.constant 0.000000e+00 : f32
    %6 = vector.broadcast %cst_5 : f32 to vector<8x256xf32>
    %7 = arith.maximumf %5, %6 : vector<8x256xf32>
    %c0_6 = arith.constant 0 : index
    %c0_7 = arith.constant 0 : index
    %8 = vector.load %arg4[%c0_6, %c0_7] : memref<256x256xf32, #tpu.memory_space<vmem>>, vector<256x256xf32>
    %cst_8 = arith.constant dense<0.000000e+00> : vector<8x256xf32>
    %9 = tpu.matmul %7, %8, %cst_8 {dimension_numbers = #tpu.dot_dimension_numbers<[1], [0], [0], [1], [0, 0, 1, 1], [], []>} : vector<8x256xf32>, vector<256x256xf32>, vector<8x256xf32> -> vector<8x256xf32>
    %c0_9 = arith.constant 0 : index
    %c0_10 = arith.constant 0 : index
    %10 = vector.load %arg5[%c0_9, %c0_10] : memref<1x256xf32, #tpu.memory_space<vmem>>, vector<1x256xf32>
    %11 = vector.broadcast %10 : vector<1x256xf32> to vector<8x256xf32>
    %12 = arith.addf %9, %11 : vector<8x256xf32>
    %cst_11 = arith.constant 0.000000e+00 : f32
    %13 = vector.broadcast %cst_11 : f32 to vector<8x256xf32>
    %14 = arith.maximumf %12, %13 : vector<8x256xf32>
    %c0_12 = arith.constant 0 : index
    %c0_13 = arith.constant 0 : index
    %15 = vector.load %arg6[%c0_12, %c0_13] : memref<256x128xf32, #tpu.memory_space<vmem>>, vector<256x128xf32>
    %cst_14 = arith.constant dense<0.000000e+00> : vector<8x128xf32>
    %16 = tpu.matmul %14, %15, %cst_14 {dimension_numbers = #tpu.dot_dimension_numbers<[1], [0], [0], [1], [0, 0, 1, 1], [], []>} : vector<8x256xf32>, vector<256x128xf32>, vector<8x128xf32> -> vector<8x128xf32>
    %c0_15 = arith.constant 0 : index
    %c0_16 = arith.constant 0 : index
    %17 = vector.load %arg7[%c0_15, %c0_16] : memref<1x128xf32, #tpu.memory_space<vmem>>, vector<1x128xf32>
    %18 = vector.broadcast %17 : vector<1x128xf32> to vector<8x128xf32>
    %19 = arith.addf %16, %18 : vector<8x128xf32>
    %c0_17 = arith.constant 0 : index
    %c0_18 = arith.constant 0 : index
    %20 = vector.load %arg8[%c0_17, %c0_18] : memref<8x128xf32, #tpu.memory_space<vmem>>, vector<8x128xf32>
    tpu.vector_store %arg8[%c0_17, %c0_18], %19 {strides = array<i32>} : memref<8x128xf32, #tpu.memory_space<vmem>>, vector<8x128xf32>,
    return
  }
  func.func @transform_0(%arg0: i32) -> (i32, i32) {
    %c0_i32 = arith.constant 0 : i32
    %c0_i32_0 = arith.constant 0 : i32
    return %arg0, %c0_i32 : i32, i32
  }
  func.func @transform_1(%arg0: i32) -> (i32, i32) {
    %c0_i32 = arith.constant 0 : i32
    %c0_i32_0 = arith.constant 0 : i32
    %c0_i32_1 = arith.constant 0 : i32
    return %c0_i32, %c0_i32_0 : i32, i32
  }
  func.func @transform_2(%arg0: i32) -> (i32, i32) {
    %c0_i32 = arith.constant 0 : i32
    %c0_i32_0 = arith.constant 0 : i32
    %c0_i32_1 = arith.constant 0 : i32
    return %c0_i32, %c0_i32_0 : i32, i32
  }
  func.func @transform_3(%arg0: i32) -> (i32, i32) {
    %c0_i32 = arith.constant 0 : i32
    %c0_i32_0 = arith.constant 0 : i32
    %c0_i32_1 = arith.constant 0 : i32
    return %c0_i32, %c0_i32_0 : i32, i32
  }
  func.func @transform_4(%arg0: i32) -> (i32, i32) {
    %c0_i32 = arith.constant 0 : i32
    %c0_i32_0 = arith.constant 0 : i32
    %c0_i32_1 = arith.constant 0 : i32
    return %c0_i32, %c0_i32_0 : i32, i32
  }
  func.func @transform_5(%arg0: i32) -> (i32, i32) {
    %c0_i32 = arith.constant 0 : i32
    %c0_i32_0 = arith.constant 0 : i32
    %c0_i32_1 = arith.constant 0 : i32
    return %c0_i32, %c0_i32_0 : i32, i32
  }
  func.func @transform_6(%arg0: i32) -> (i32, i32) {
    %c0_i32 = arith.constant 0 : i32
    %c0_i32_0 = arith.constant 0 : i32
    %c0_i32_1 = arith.constant 0 : i32
    return %c0_i32, %c0_i32_0 : i32, i32
  }
  func.func @transform_7(%arg0: i32) -> (i32, i32) {
    %c0_i32 = arith.constant 0 : i32
    %c0_i32_0 = arith.constant 0 : i32
    return %arg0, %c0_i32 : i32, i32
  }
}

</mosaic_0001>

<bundles_post_ra>
// kernel: simple_msnn_forward.1
= control target key start
LH: loop header
LB: loop body
LE: loop exit
PB: predicated region body
PF: predicated region fallthrough
CT: control target
= control target key end

     0   :  { %s2391_s1 = inlined_call_operand.vmem [shape: f32[1024,256], index: 1, kind: input, shape index: {}]   ;;  %s2392_s0 = inlined_call_operand.vmem [shape: f32[8,1024], index: 0, kind: input, shape index: {}]   ;;  %s2393_s3 = inlined_call_operand.vmem [shape: f32[256,256], index: 3, kind: input, shape index: {}]   ;;  %s2394_s5 = inlined_call_operand.vmem [shape: f32[256,128], index: 5, kind: input, shape index: {}]   ;;  %s2395_s2 = inlined_call_operand.vmem [shape: f32[1,256], index: 2, kind: input, shape index: {}]   ;;  %s2396_s4 = inlined_call_operand.vmem [shape: f32[1,256], index: 4, kind: input, shape index: {}]   ;;  %s2397_s6 = inlined_call_operand.vmem [shape: f32[1,128], index: 6, kind: input, shape index: {}]   ;;  %s2398_s7 = inlined_call_operand.vmem [shape: f32[8,128], index: 7, kind: output, shape index: {}]  }
   0x1   :  { %v99_v0 = vld [vmem:[%s2391_s1 + $0x208] sm:$0xff]  ;;  %v101_v1 = vld [vmem:[%s2391_s1 + $0x218] sm:$0xff]  ;;  %v98_v2 = vld [vmem:[%s2391_s1 + $0x200] sm:$0xff] }
   0x2   :  { %v951_v3 = vpack.c.bf16 %v101_v1, %v99_v0  ;;  %v100_v4 = vld [vmem:[%s2391_s1 + $0x210] sm:$0xff]  ;;  %v103_v5 = vld [vmem:[%s2391_s1 + $0x228] sm:$0xff]  ;;  %v105_v6 = vld [vmem:[%s2391_s1 + $0x238] sm:$0xff] }
   0x3   :  { %v953_v7 = vpack.c.bf16 %v100_v4, %v98_v2  ;;  %v955_v8 = vpack.c.bf16 %v105_v6, %v103_v5  ;;  %v102_v9 = vld [vmem:[%s2391_s1 + $0x220] sm:$0xff]  ;;  %v104_v10 = vld [vmem:[%s2391_s1 + $0x230] sm:$0xff]  ;;  %v107_v11 = vld [vmem:[%s2391_s1 + $0x248] sm:$0xff] }
   0x4   :  { %952 = vmatprep.subr.bf16.mxu0 %v951_v3  ;;  %v109_v12 = vld [vmem:[%s2391_s1 + $0x258] sm:$0xff]  ;;  %v957_v13 = vpack.c.bf16 %v104_v10, %v102_v9  ;;  %v106_v15 = vld [vmem:[%s2391_s1 + $0x240] sm:$0xff]  ;;  %v108_v16 = vld [vmem:[%s2391_s1 + $0x250] sm:$0xff] }
   0x5   :  { %954 = vmatpush1.bf16.msra.mxu0 %v953_v7  ;;  %v959_v14 = vpack.c.bf16 %v109_v12, %v107_v11  ;;  %v111_v17 = vld [vmem:[%s2391_s1 + $0x268] sm:$0xff]  ;;  %v113_v18 = vld [vmem:[%s2391_s1 + $0x278] sm:$0xff]  ;;  %v961_v19 = vpack.c.bf16 %v108_v16, %v106_v15  ;;  %v110_v21 = vld [vmem:[%s2391_s1 + $0x260] sm:$0xff] }
   0x6   :  { %956 = vmatprep.subr.bf16.mxu0 %v955_v8  ;;  %v963_v20 = vpack.c.bf16 %v113_v18, %v111_v17  ;;  %v112_v22 = vld [vmem:[%s2391_s1 + $0x270] sm:$0xff]  ;;  %v115_v23 = vld [vmem:[%s2391_s1 + $0x288] sm:$0xff]  ;;  %v117_v24 = vld [vmem:[%s2391_s1 + $0x298] sm:$0xff] }
   0x7   :  { %v965_v25 = vpack.c.bf16 %v112_v22, %v110_v21  ;;  %v967_v26 = vpack.c.bf16 %v117_v24, %v115_v23  ;;  %v114_v27 = vld [vmem:[%s2391_s1 + $0x280] sm:$0xff]  ;;  %v116_v28 = vld [vmem:[%s2391_s1 + $0x290] sm:$0xff]  ;;  %v119_v29 = vld [vmem:[%s2391_s1 + $0x2a8] sm:$0xff] }
   0x8   :  { %v121_v30 = vld [vmem:[%s2391_s1 + $0x2b8] sm:$0xff]  ;;  %v969_v31 = vpack.c.bf16 %v116_v28, %v114_v27  ;;  %v118_v33 = vld [vmem:[%s2391_s1 + $0x2a0] sm:$0xff]  ;;  %v120_v34 = vld [vmem:[%s2391_s1 + $0x2b0] sm:$0xff] }
   0x9   :  { %958 = vmatpush1.bf16.msra.mxu0 %v957_v13  ;;  %v971_v32 = vpack.c.bf16 %v121_v30, %v119_v29  ;;  %v123_v35 = vld [vmem:[%s2391_s1 + $0x2c8] sm:$0xff]  ;;  %v125_v36 = vld [vmem:[%s2391_s1 + $0x2d8] sm:$0xff]  ;;  %v973_v37 = vpack.c.bf16 %v120_v34, %v118_v33  ;;  %v122_v39 = vld [vmem:[%s2391_s1 + $0x2c0] sm:$0xff] }
   0xa   :  { %960 = vmatprep.subr.bf16.mxu0 %v959_v14  ;;  %v975_v38 = vpack.c.bf16 %v125_v36, %v123_v35  ;;  %v124_v40 = vld [vmem:[%s2391_s1 + $0x2d0] sm:$0xff]  ;;  %v29_v41 = vld [vmem:[%s2392_s0 + $0x18] sm:$0xff]  ;;  %v127_v42 = vld [vmem:[%s2391_s1 + $0x2e8] sm:$0xff] }
   0xb   :  { %v129_v43 = vld [vmem:[%s2391_s1 + $0x2f8] sm:$0xff]  ;;  %437 = vmatprep.mubr.f32.mxu0 %v29_v41  ;;  %v977_v44 = vpack.c.bf16 %v124_v40, %v122_v39  ;;  %v126_v46 = vld [vmem:[%s2391_s1 + $0x2e0] sm:$0xff]  ;;  %v128_v47 = vld [vmem:[%s2391_s1 + $0x2f0] sm:$0xff] }
   0xc   :  { %v979_v45 = vpack.c.bf16 %v129_v43, %v127_v42  ;;  %v131_v48 = vld [vmem:[%s2391_s1 + $0x308] sm:$0xff]  ;;  %v133_v49 = vld [vmem:[%s2391_s1 + $0x318] sm:$0xff]  ;;  %v981_v50 = vpack.c.bf16 %v128_v47, %v126_v46  ;;  %v130_v52 = vld [vmem:[%s2391_s1 + $0x300] sm:$0xff] }
   0xd   :  { %962 = vmatpush1.bf16.msra.mxu0 %v961_v19  ;;  %v983_v51 = vpack.c.bf16 %v133_v49, %v131_v48  ;;  %v132_v53 = vld [vmem:[%s2391_s1 + $0x310] sm:$0xff]  ;;  %v135_v54 = vld [vmem:[%s2391_s1 + $0x328] sm:$0xff]  ;;  %v137_v55 = vld [vmem:[%s2391_s1 + $0x338] sm:$0xff] }
   0xe   :  { %964 = vmatprep.subr.bf16.mxu0 %v963_v20  ;;  %v985_v56 = vpack.c.bf16 %v132_v53, %v130_v52  ;;  %v987_v57 = vpack.c.bf16 %v137_v55, %v135_v54  ;;  %v134_v58 = vld [vmem:[%s2391_s1 + $0x320] sm:$0xff]  ;;  %v136_v59 = vld [vmem:[%s2391_s1 + $0x330] sm:$0xff]  ;;  %v139_v60 = vld [vmem:[%s2391_s1 + $0x348] sm:$0xff] }
   0xf   :  { %v141_v61 = vld [vmem:[%s2391_s1 + $0x358] sm:$0xff]  ;;  %v989_v62 = vpack.c.bf16 %v136_v59, %v134_v58  ;;  %v138_v0 = vld [vmem:[%s2391_s1 + $0x340] sm:$0xff]  ;;  %v140_v1 = vld [vmem:[%s2391_s1 + $0x350] sm:$0xff] }
  0x10   :  { %v991_v63 = vpack.c.bf16 %v141_v61, %v139_v60  ;;  %v143_v2 = vld [vmem:[%s2391_s1 + $0x368] sm:$0xff]  ;;  %v145_v3 = vld [vmem:[%s2391_s1 + $0x378] sm:$0xff]  ;;  %v993_v4 = vpack.c.bf16 %v140_v1, %v138_v0  ;;  %v142_v6 = vld [vmem:[%s2391_s1 + $0x360] sm:$0xff] }
  0x11   :  { %966 = vmatpush1.bf16.msra.mxu0 %v965_v25  ;;  %v995_v5 = vpack.c.bf16 %v145_v3, %v143_v2  ;;  %v144_v7 = vld [vmem:[%s2391_s1 + $0x370] sm:$0xff]  ;;  %v147_v8 = vld [vmem:[%s2391_s1 + $0x388] sm:$0xff]  ;;  %v149_v9 = vld [vmem:[%s2391_s1 + $0x398] sm:$0xff] }
  0x12   :  { %968 = vmatprep.subr.bf16.mxu0 %v967_v26  ;;  %v35_v10 = vld [vmem:[%s2391_s1 + $0x8] sm:$0xff]  ;;  %v37_v11 = vld [vmem:[%s2391_s1 + $0x18] sm:$0xff]  ;;  %v997_v12 = vpack.c.bf16 %v144_v7, %v142_v6  ;;  %v34_v14 = vld [vmem:[%s2391_s1] sm:$0xff]  ;;  %v999_v16 = vpack.c.bf16 %v149_v9, %v147_v8 }
  0x13   :  { %v887_v13 = vpack.c.bf16 %v37_v11, %v35_v10  ;;  %v36_v15 = vld [vmem:[%s2391_s1 + $0x10] sm:$0xff]  ;;  %v146_v17 = vld [vmem:[%s2391_s1 + $0x380] sm:$0xff]  ;;  %v39_v20 = vld [vmem:[%s2391_s1 + $0x28] sm:$0xff] }
  0x14   :  { %v148_v18 = vld [vmem:[%s2391_s1 + $0x390] sm:$0xff]  ;;  %v889_v19 = vpack.c.bf16 %v36_v15, %v34_v14  ;;  %v151_v21 = vld [vmem:[%s2391_s1 + $0x3a8] sm:$0xff]  ;;  %v153_v22 = vld [vmem:[%s2391_s1 + $0x3b8] sm:$0xff] }
  0x15   :  { %970 = vmatpush1.bf16.msra.mxu0 %v969_v31  ;;  %888 = vmatprep.subr.bf16.mxu1 %v887_v13  ;;  %v41_v23 = vld [vmem:[%s2391_s1 + $0x38] sm:$0xff]  ;;  %v38_v25 = vld [vmem:[%s2391_s1 + $0x20] sm:$0xff]  ;;  %v40_v26 = vld [vmem:[%s2391_s1 + $0x30] sm:$0xff]  ;;  %v1001_v27 = vpack.c.bf16 %v148_v18, %v146_v17  ;;  %v1003_v31 = vpack.c.bf16 %v153_v22, %v151_v21 }
  0x16   :  { %972 = vmatprep.subr.bf16.mxu0 %v971_v32  ;;  %890 = vmatpush1.bf16.msra.mxu1 %v889_v19  ;;  %v891_v24 = vpack.c.bf16 %v41_v23, %v39_v20  ;;  %v150_v28 = vld [vmem:[%s2391_s1 + $0x3a0] sm:$0xff]  ;;  %v893_v29 = vpack.c.bf16 %v40_v26, %v38_v25  ;;  %v43_v30 = vld [vmem:[%s2391_s1 + $0x48] sm:$0xff]  ;;  %v152_v32 = vld [vmem:[%s2391_s1 + $0x3b0] sm:$0xff] }
  0x17   :  { %v155_v33 = vld [vmem:[%s2391_s1 + $0x3c8] sm:$0xff]  ;;  %v45_v34 = vld [vmem:[%s2391_s1 + $0x58] sm:$0xff]  ;;  %v1005_v42 = vpack.c.bf16 %v152_v32, %v150_v28  ;;  %v154_v43 = vld [vmem:[%s2391_s1 + $0x3c0] sm:$0xff] }
  0x18   :  { %892 = vmatprep.subr.bf16.mxu1 %v891_v24  ;;  %v157_v35 = vld [vmem:[%s2391_s1 + $0x3d8] sm:$0xff]  ;;  %v895_v36 = vpack.c.bf16 %v45_v34, %v43_v30  ;;  %v47_v40 = vld [vmem:[%s2391_s1 + $0x68] sm:$0xff]  ;;  %v156_v47 = vld [vmem:[%s2391_s1 + $0x3d0] sm:$0xff] }
  0x19   :  { %974 = vmatpush1.bf16.msra.mxu0 %v973_v37  ;;  %v42_v37 = vld [vmem:[%s2391_s1 + $0x40] sm:$0xff]  ;;  %v49_v41 = vld [vmem:[%s2391_s1 + $0x78] sm:$0xff]  ;;  %v1007_v46 = vpack.c.bf16 %v157_v35, %v155_v33  ;;  %v159_v48 = vld [vmem:[%s2391_s1 + $0x3e8] sm:$0xff]  ;;  %v1009_v54 = vpack.c.bf16 %v156_v47, %v154_v43 }
  0x1a   :  { %976 = vmatprep.subr.bf16.mxu0 %v975_v38  ;;  %v44_v38 = vld [vmem:[%s2391_s1 + $0x50] sm:$0xff]  ;;  %894 = vmatpush1.bf16.msra.mxu1 %v893_v29  ;;  %v53_v52 = vld [vmem:[%s2391_s1 + $0x98] sm:$0xff]  ;;  %v158_v55 = vld [vmem:[%s2391_s1 + $0x3e0] sm:$0xff] }
  0x1b   :  { %v897_v39 = vpack.c.bf16 %v44_v38, %v42_v37  ;;  %896 = vmatprep.subr.bf16.mxu1 %v895_v36  ;;  %v48_v49 = vld [vmem:[%s2391_s1 + $0x70] sm:$0xff]  ;;  %v55_v61 = vld [vmem:[%s2391_s1 + $0xa8] sm:$0xff]  ;;  %v165_v0 = vld [vmem:[%s2391_s1 + $0x418] sm:$0xff] }
  0x1c   :  { %v52_v58 = vld [vmem:[%s2391_s1 + $0x90] sm:$0xff]  ;;  %v162_v7 = vld [vmem:[%s2391_s1 + $0x400] sm:$0xff]  ;;  %v167_v9 = vld [vmem:[%s2391_s1 + $0x428] sm:$0xff] }
  0x1d   :  { %978 = vmatpush1.bf16.msra.mxu0 %v977_v44  ;;  %v899_v44 = vpack.c.bf16 %v49_v41, %v47_v40  ;;  %v160_v60 = vld [vmem:[%s2391_s1 + $0x3f0] sm:$0xff]  ;;  %v169_v10 = vld [vmem:[%s2391_s1 + $0x438] sm:$0xff]  ;;  %v59_v11 = vld [vmem:[%s2391_s1 + $0xc8] sm:$0xff] }
  0x1e   :  { %980 = vmatprep.subr.bf16.mxu0 %v979_v45  ;;  %v46_v45 = vld [vmem:[%s2391_s1 + $0x60] sm:$0xff]  ;;  %898 = vmatpush1.bf16.msra.mxu1 %v897_v39  ;;  %v1013_v2 = vpack.c.bf16 %v160_v60, %v158_v55  ;;  %v164_v8 = vld [vmem:[%s2391_s1 + $0x410] sm:$0xff]  ;;  %v1019_v20 = vpack.c.bf16 %v169_v10, %v167_v9  ;;  %v31_v21 = vld [vmem:[%s2392_s0 + $0x28] sm:$0xff] }
  0x1f   :  { %v901_v53 = vpack.c.bf16 %v48_v49, %v46_v45  ;;  %900 = vmatprep.subr.bf16.mxu1 %v899_v44  ;;  %v28_v13 = vld [vmem:[%s2392_s0 + $0x10] sm:$0xff]  ;;  %v166_v14 = vld [vmem:[%s2391_s1 + $0x420] sm:$0xff]  ;;  %v63_v23 = vld [vmem:[%s2391_s1 + $0xe8] sm:$0xff] }
  0x20   :  { %v168_v17 = vld [vmem:[%s2391_s1 + $0x430] sm:$0xff]  ;;  %v58_v18 = vld [vmem:[%s2391_s1 + $0xc0] sm:$0xff]  ;;  %v65_v24 = vld [vmem:[%s2391_s1 + $0xf8] sm:$0xff] }
  0x21   :  { %982 = vmatpush1.bf16.msra.mxu0 %v981_v50  ;;  %v161_v50 = vld [vmem:[%s2391_s1 + $0x3f8] sm:$0xff]  ;;  %v60_v19 = vld [vmem:[%s2391_s1 + $0xd0] sm:$0xff]  ;;  %v171_v25 = vld [vmem:[%s2391_s1 + $0x448] sm:$0xff]  ;;  %v1021_v28 = vpack.c.bf16 %v168_v17, %v166_v14  ;;  %v915_v30 = vpack.c.bf16 %v65_v24, %v63_v23 }
  0x22   :  { %984 = vmatprep.subr.bf16.mxu0 %v983_v51  ;;  %v51_v51 = vld [vmem:[%s2391_s1 + $0x88] sm:$0xff]  ;;  %v1011_v59 = vpack.c.bf16 %v161_v50, %v159_v48  ;;  %902 = vmatpush1.bf16.msra.mxu1 %v901_v53  ;;  %v173_v26 = vld [vmem:[%s2391_s1 + $0x458] sm:$0xff]  ;;  %v170_v29 = vld [vmem:[%s2391_s1 + $0x440] sm:$0xff] }
  0x23   :  { %v64_v32 = vld [vmem:[%s2391_s1 + $0xf0] sm:$0xff]  ;;  %v1023_v33 = vpack.c.bf16 %v173_v26, %v171_v25  ;;  %v67_v35 = vld [vmem:[%s2391_s1 + $0x108] sm:$0xff]  ;;  %v69_v36 = vld [vmem:[%s2391_s1 + $0x118] sm:$0xff] }
  0x24   :  { %v172_v34 = vld [vmem:[%s2391_s1 + $0x450] sm:$0xff]  ;;  %v175_v37 = vld [vmem:[%s2391_s1 + $0x468] sm:$0xff]  ;;  %v177_v38 = vld [vmem:[%s2391_s1 + $0x478] sm:$0xff] }
  0x25   :  { %986 = vmatpush1.bf16.msra.mxu0 %v985_v56  ;;  %v903_v56 = vpack.c.bf16 %v53_v52, %v51_v51  ;;  %v1025_v40 = vpack.c.bf16 %v172_v34, %v170_v29  ;;  %v174_v41 = vld [vmem:[%s2391_s1 + $0x460] sm:$0xff]  ;;  %v68_v44 = vld [vmem:[%s2391_s1 + $0x110] sm:$0xff]  ;;  %v1027_v45 = vpack.c.bf16 %v177_v38, %v175_v37  ;;  %v71_v47 = vld [vmem:[%s2391_s1 + $0x128] sm:$0xff] }
  0x26   :  { %988 = vmatprep.subr.bf16.mxu0 %v987_v57  ;;  %v50_v57 = vld [vmem:[%s2391_s1 + $0x80] sm:$0xff]  ;;  %v73_v48 = vld [vmem:[%s2391_s1 + $0x138] sm:$0xff]  ;;  %v179_v49 = vld [vmem:[%s2391_s1 + $0x488] sm:$0xff] }
  0x27   :  { %v905_v1 = vpack.c.bf16 %v52_v58, %v50_v57  ;;  %904 = vmatprep.subr.bf16.mxu1 %v903_v56  ;;  %v66_v43 = vld [vmem:[%s2391_s1 + $0x100] sm:$0xff]  ;;  %v181_v50 = vld [vmem:[%s2391_s1 + $0x498] sm:$0xff]  ;;  %v72_v56 = vld [vmem:[%s2391_s1 + $0x130] sm:$0xff] }
  0x28   :  { %v921_v51 = vpack.c.bf16 %v68_v44, %v66_v43  ;;  %v178_v53 = vld [vmem:[%s2391_s1 + $0x480] sm:$0xff]  ;;  %v1031_v57 = vpack.c.bf16 %v181_v50, %v179_v49  ;;  %v180_v58 = vld [vmem:[%s2391_s1 + $0x490] sm:$0xff]  ;;  %v77_v60 = vld [vmem:[%s2391_s1 + $0x158] sm:$0xff] }
  0x29   :  { %990 = vmatpush1.bf16.msra.mxu0 %v989_v62  ;;  %v57_v62 = vld [vmem:[%s2391_s1 + $0xb8] sm:$0xff]  ;;  %906 = vmatpush1.bf16.msra.mxu1 %v905_v1  ;;  %v70_v55 = vld [vmem:[%s2391_s1 + $0x120] sm:$0xff]  ;;  %v187_v9 = vld [vmem:[%s2391_s1 + $0x4c8] sm:$0xff] }
  0x2a   :  { %992 = vmatprep.subr.bf16.mxu0 %v991_v63  ;;  %v163_v63 = vld [vmem:[%s2391_s1 + $0x408] sm:$0xff]  ;;  %v907_v3 = vpack.c.bf16 %v57_v62, %v55_v61  ;;  %v185_v62 = vld [vmem:[%s2391_s1 + $0x4b8] sm:$0xff]  ;;  %v182_v1 = vld [vmem:[%s2391_s1 + $0x4a0] sm:$0xff] }
  0x2b   :  { %v1015_v6 = vpack.c.bf16 %v165_v0, %v163_v63  ;;  %v183_v61 = vld [vmem:[%s2391_s1 + $0x4a8] sm:$0xff]  ;;  %v925_v63 = vpack.c.bf16 %v72_v56, %v70_v55  ;;  %v1033_v0 = vpack.c.bf16 %v180_v58, %v178_v53  ;;  %v189_v10 = vld [vmem:[%s2391_s1 + $0x4d8] sm:$0xff]  ;;  %v188_v14 = vld [vmem:[%s2391_s1 + $0x4d0] sm:$0xff] }
  0x2c   :  { %908 = vmatprep.subr.bf16.mxu1 %v907_v3  ;;  %v74_v3 = vld [vmem:[%s2391_s1 + $0x140] sm:$0xff]  ;;  %v80_v17 = vld [vmem:[%s2391_s1 + $0x170] sm:$0xff]  ;;  %v193_v23 = vld [vmem:[%s2391_s1 + $0x4f8] sm:$0xff] }
  0x2d   :  { %994 = vmatpush1.bf16.msra.mxu0 %v993_v4  ;;  %v54_v4 = vld [vmem:[%s2391_s1 + $0xa0] sm:$0xff]  ;;  %v84_v29 = vld [vmem:[%s2391_s1 + $0x190] sm:$0xff]  ;;  %v195_v34 = vld [vmem:[%s2391_s1 + $0x508] sm:$0xff] }
  0x2e   :  { %996 = vmatprep.subr.bf16.mxu0 %v995_v5  ;;  %v56_v5 = vld [vmem:[%s2391_s1 + $0xb0] sm:$0xff]  ;;  %v190_v26 = vld [vmem:[%s2391_s1 + $0x4e0] sm:$0xff]  ;;  %v91_v44 = vld [vmem:[%s2391_s1 + $0x1c8] sm:$0xff] }
  0x2f   :  { %v909_v15 = vpack.c.bf16 %v56_v5, %v54_v4  ;;  %v76_v4 = vld [vmem:[%s2391_s1 + $0x150] sm:$0xff]  ;;  %v1035_v5 = vpack.c.bf16 %v185_v62, %v183_v61  ;;  %v194_v38 = vld [vmem:[%s2391_s1 + $0x500] sm:$0xff]  ;;  %v95_v56 = vld [vmem:[%s2391_s1 + $0x1e8] sm:$0xff] }
  0x30   :  { %v196_v43 = vld [vmem:[%s2391_s1 + $0x510] sm:$0xff]  ;;  %v198_v50 = vld [vmem:[%s2391_s1 + $0x520] sm:$0xff]  ;;  %v203_v58 = vld [vmem:[%s2391_s1 + $0x548] sm:$0xff] }
  0x31   :  { %998 = vmatpush1.bf16.msra.mxu0 %v997_v12  ;;  %v61_v12 = vld [vmem:[%s2391_s1 + $0xd8] sm:$0xff]  ;;  %910 = vmatpush1.bf16.msra.mxu1 %v909_v15  ;;  %v1049_v49 = vpack.c.bf16 %v196_v43, %v194_v38  ;;  %v92_v53 = vld [vmem:[%s2391_s1 + $0x1d0] sm:$0xff]  ;;  %v202_v62 = vld [vmem:[%s2391_s1 + $0x540] sm:$0xff] }
  0x32   :  { %1000 = vmatprep.subr.bf16.mxu0 %v999_v16  ;;  %v1017_v16 = vpack.c.bf16 %v164_v8, %v162_v7  ;;  %v911_v22 = vpack.c.bf16 %v61_v12, %v59_v11  ;;  %v79_v7 = vld [vmem:[%s2391_s1 + $0x168] sm:$0xff]  ;;  %v81_v8 = vld [vmem:[%s2391_s1 + $0x178] sm:$0xff]  ;;  %v186_v11 = vld [vmem:[%s2391_s1 + $0x4c0] sm:$0xff]  ;;  %v929_v12 = vpack.c.bf16 %v76_v4, %v74_v3 }
  0x33   :  { %v931_v15 = vpack.c.bf16 %v81_v8, %v79_v7  ;;  %v1041_v25 = vpack.c.bf16 %v188_v14, %v186_v11  ;;  %v200_v55 = vld [vmem:[%s2391_s1 + $0x530] sm:$0xff]  ;;  %v589_v4 = vld [vmem:[%s2393_s3 + $0x8] sm:$0xff]  ;;  %v209_v7 = vld [vmem:[%s2391_s1 + $0x578] sm:$0xff] }
  0x34   :  { %912 = vmatprep.subr.bf16.mxu1 %v911_v22  ;;  %v191_v22 = vld [vmem:[%s2391_s1 + $0x4e8] sm:$0xff]  ;;  %v1053_v61 = vpack.c.bf16 %v200_v55, %v198_v50  ;;  %v204_v3 = vld [vmem:[%s2391_s1 + $0x550] sm:$0xff] }
  0x35   :  { %1002 = vmatpush1.bf16.msra.mxu0 %v1001_v27  ;;  %v913_v27 = vpack.c.bf16 %v60_v19, %v58_v18  ;;  %v1039_v18 = vpack.c.bf16 %v189_v10, %v187_v9  ;;  %v83_v19 = vld [vmem:[%s2391_s1 + $0x188] sm:$0xff]  ;;  %v1057_v9 = vpack.c.bf16 %v204_v3, %v202_v62  ;;  %v206_v10 = vld [vmem:[%s2391_s1 + $0x560] sm:$0xff]  ;;  %v598_v38 = vld [vmem:[%s2393_s3 + $0x50] sm:$0xff] }
  0x36   :  { %1004 = vmatprep.subr.bf16.mxu0 %v1003_v31  ;;  %v62_v31 = vld [vmem:[%s2391_s1 + $0xe0] sm:$0xff]  ;;  %v219_v43 = vld [vmem:[%s2391_s1 + $0x5c8] sm:$0xff]  ;;  %v602_v50 = vld [vmem:[%s2393_s3 + $0x70] sm:$0xff] }
  0x37   :  { %914 = vmatpush1.bf16.msra.mxu1 %v913_v27  ;;  %v917_v39 = vpack.c.bf16 %v64_v32, %v62_v31  ;;  %v192_v31 = vld [vmem:[%s2391_s1 + $0x4f0] sm:$0xff]  ;;  %v87_v32 = vld [vmem:[%s2391_s1 + $0x1a8] sm:$0xff] }
  0x38   :  { %916 = vmatprep.subr.bf16.mxu1 %v915_v30  ;;  %v1043_v30 = vpack.c.bf16 %v193_v23, %v191_v22  ;;  %v1045_v37 = vpack.c.bf16 %v192_v31, %v190_v26  ;;  %v210_v23 = vld [vmem:[%s2391_s1 + $0x580] sm:$0xff]  ;;  %v594_v26 = vld [vmem:[%s2393_s3 + $0x30] sm:$0xff]  ;;  %v215_v31 = vld [vmem:[%s2391_s1 + $0x5a8] sm:$0xff] }
  0x39   :  { %1006 = vmatpush1.bf16.msra.mxu0 %v1005_v42  ;;  %v919_v42 = vpack.c.bf16 %v69_v36, %v67_v35  ;;  %v197_v35 = vld [vmem:[%s2391_s1 + $0x518] sm:$0xff]  ;;  %v223_v55 = vld [vmem:[%s2391_s1 + $0x5e8] sm:$0xff]  ;;  %v606_v62 = vld [vmem:[%s2393_s3 + $0x90] sm:$0xff] }
  0x3a   :  { %1008 = vmatprep.subr.bf16.mxu0 %v1007_v46  ;;  %v176_v46 = vld [vmem:[%s2391_s1 + $0x470] sm:$0xff]  ;;  %v227_v3 = vld [vmem:[%s2391_s1 + $0x608] sm:$0xff] }
  0x3b   :  { %918 = vmatpush1.bf16.msra.mxu1 %v917_v39  ;;  %v1029_v52 = vpack.c.bf16 %v176_v46, %v174_v41  ;;  %v88_v41 = vld [vmem:[%s2391_s1 + $0x1b0] sm:$0xff]  ;;  %v199_v46 = vld [vmem:[%s2391_s1 + $0x528] sm:$0xff] }
  0x3c   :  { %920 = vmatprep.subr.bf16.mxu1 %v919_v42  ;;  %v1047_v42 = vpack.c.bf16 %v197_v35, %v195_v34  ;;  %v214_v35 = vld [vmem:[%s2391_s1 + $0x5a0] sm:$0xff] }
  0x3d   :  { %1010 = vmatpush1.bf16.msra.mxu0 %v1009_v54  ;;  %v923_v54 = vpack.c.bf16 %v73_v48, %v71_v47  ;;  %v201_v47 = vld [vmem:[%s2391_s1 + $0x538] sm:$0xff] }
  0x3e   :  { %1012 = vmatprep.subr.bf16.mxu0 %v1011_v59  ;;  %v75_v59 = vld [vmem:[%s2391_s1 + $0x148] sm:$0xff] }
  0x3f   :  { %922 = vmatpush1.bf16.msra.mxu1 %v921_v51 }
  0x40   :  { %924 = vmatprep.subr.bf16.mxu1 %v923_v54  ;;  %v1051_v54 = vpack.c.bf16 %v201_v47, %v199_v46  ;;  %v218_v47 = vld [vmem:[%s2391_s1 + $0x5c0] sm:$0xff] }
  0x41   :  { %1014 = vmatpush1.bf16.msra.mxu0 %v1013_v2  ;;  %v927_v2 = vpack.c.bf16 %v77_v60, %v75_v59  ;;  %v205_v59 = vld [vmem:[%s2391_s1 + $0x558] sm:$0xff] }
  0x42   :  { %1016 = vmatprep.subr.bf16.mxu0 %v1015_v6  ;;  %v184_v6 = vld [vmem:[%s2391_s1 + $0x4b0] sm:$0xff] }
  0x43   :  { %926 = vmatpush1.bf16.msra.mxu1 %v925_v63 }
  0x44   :  { %438 = vmatmul.mubr.f32.vlgmr.msra.gmra.mrb[0].mxu0 %v28_v13  ;;  %v1037_v13 = vpack.c.bf16 %v184_v6, %v182_v1  ;;  %928 = vmatprep.subr.bf16.mxu1 %v927_v2  ;;  %v96_v1 = vld [vmem:[%s2391_s1 + $0x1f0] sm:$0xff]  ;;  %v1055_v2 = vpack.c.bf16 %v205_v59, %v203_v58  ;;  %v207_v6 = vld [vmem:[%s2391_s1 + $0x568] sm:$0xff]  ;;  %v222_v59 = vld [vmem:[%s2391_s1 + $0x5e0] sm:$0xff] }
  0x45   :  { %1018 = vmatpush1.bf16.msra.mxu0 %v1017_v16  ;;  %508 = vmatprep.mubr.f32.mxu0 %v31_v21  ;;  %v78_v16 = vld [vmem:[%s2391_s1 + $0x160] sm:$0xff]  ;;  %v27_v21 = vld [vmem:[%s2392_s0 + $0x8] sm:$0xff]  ;;  %v1059_v14 = vpack.c.bf16 %v209_v7, %v207_v6 }
  0x46   :  { %1020 = vmatprep.subr.bf16.mxu0 %v1019_v20  ;;  %v85_v20 = vld [vmem:[%s2391_s1 + $0x198] sm:$0xff]  ;;  %366 = vmatprep.mubr.f32.mxu1 %v27_v21  ;;  %v933_v24 = vpack.c.bf16 %v80_v17, %v78_v16  ;;  %v593_v16 = vld [vmem:[%s2393_s3 + $0x28] sm:$0xff] }
  0x47   :  { %930 = vmatpush1.bf16.msra.mxu1 %v929_v12  ;;  %v935_v27 = vpack.c.bf16 %v85_v20, %v83_v19  ;;  %v588_v12 = vld [vmem:[%s2393_s3] sm:$0xff]  ;;  %v595_v17 = vld [vmem:[%s2393_s3 + $0x38] sm:$0xff] }
  0x48   :  { %932 = vmatprep.subr.bf16.mxu1 %v931_v15  ;;  %v208_v15 = vld [vmem:[%s2391_s1 + $0x570] sm:$0xff]  ;;  %v213_v19 = vld [vmem:[%s2391_s1 + $0x598] sm:$0xff]  ;;  %v26_v20 = vld [vmem:[%s2392_s0] sm:$0xff] }
  0x49   :  { %1022 = vmatpush1.bf16.msra.mxu0 %v1021_v28  ;;  %v82_v28 = vld [vmem:[%s2391_s1 + $0x180] sm:$0xff]  ;;  %v1061_v22 = vpack.c.bf16 %v208_v15, %v206_v10  ;;  %v613_v15 = vld [vmem:[%s2393_s3 + $0xc8] sm:$0xff] }
  0x4a   :  { %1024 = vmatprep.subr.bf16.mxu0 %v1023_v33  ;;  %v89_v33 = vld [vmem:[%s2391_s1 + $0x1b8] sm:$0xff]  ;;  %v937_v36 = vpack.c.bf16 %v84_v29, %v82_v28  ;;  %v212_v28 = vld [vmem:[%s2391_s1 + $0x590] sm:$0xff]  ;;  %v597_v29 = vld [vmem:[%s2393_s3 + $0x48] sm:$0xff] }
  0x4b   :  { %934 = vmatpush1.bf16.msra.mxu1 %v933_v24  ;;  %v939_v39 = vpack.c.bf16 %v89_v33, %v87_v32  ;;  %v1147_v24 = vpack.c.bf16 %v595_v17, %v593_v16  ;;  %v217_v32 = vld [vmem:[%s2391_s1 + $0x5b8] sm:$0xff]  ;;  %v1065_v34 = vpack.c.bf16 %v212_v28, %v210_v23  ;;  %v30_v17 = vld [vmem:[%s2392_s0 + $0x20] sm:$0xff]  ;;  %v614_v23 = vld [vmem:[%s2393_s3 + $0xd0] sm:$0xff] }
  0x4c   :  { %936 = vmatprep.subr.bf16.mxu1 %v935_v27  ;;  %v615_v16 = vld [vmem:[%s2393_s3 + $0xd8] sm:$0xff] }
  0x4d   :  { %1026 = vmatpush1.bf16.msra.mxu0 %v1025_v40  ;;  %v86_v40 = vld [vmem:[%s2391_s1 + $0x1a0] sm:$0xff]  ;;  %v619_v28 = vld [vmem:[%s2393_s3 + $0xf8] sm:$0xff] }
  0x4e   :  { %1028 = vmatprep.subr.bf16.mxu0 %v1027_v45  ;;  %v93_v45 = vld [vmem:[%s2391_s1 + $0x1d8] sm:$0xff]  ;;  %v941_v48 = vpack.c.bf16 %v88_v41, %v86_v40  ;;  %v216_v40 = vld [vmem:[%s2391_s1 + $0x5b0] sm:$0xff]  ;;  %v601_v41 = vld [vmem:[%s2393_s3 + $0x68] sm:$0xff] }
  0x4f   :  { %938 = vmatpush1.bf16.msra.mxu1 %v937_v36  ;;  %v943_v51 = vpack.c.bf16 %v93_v45, %v91_v44  ;;  %v221_v44 = vld [vmem:[%s2391_s1 + $0x5d8] sm:$0xff]  ;;  %v1069_v46 = vpack.c.bf16 %v216_v40, %v214_v35  ;;  %v616_v35 = vld [vmem:[%s2393_s3 + $0xe0] sm:$0xff] }
  0x50   :  { %940 = vmatprep.subr.bf16.mxu1 %v939_v39  ;;  %v1067_v39 = vpack.c.bf16 %v217_v32, %v215_v31  ;;  %v623_v40 = vld [vmem:[%s2393_s3 + $0x118] sm:$0xff] }
  0x51   :  { %1030 = vmatpush1.bf16.msra.mxu0 %v1029_v52  ;;  %v90_v52 = vld [vmem:[%s2391_s1 + $0x1c0] sm:$0xff] }
  0x52   :  { %1032 = vmatprep.subr.bf16.mxu0 %v1031_v57  ;;  %v97_v57 = vld [vmem:[%s2391_s1 + $0x1f8] sm:$0xff]  ;;  %v945_v60 = vpack.c.bf16 %v92_v53, %v90_v52  ;;  %v220_v52 = vld [vmem:[%s2391_s1 + $0x5d0] sm:$0xff]  ;;  %v605_v53 = vld [vmem:[%s2393_s3 + $0x88] sm:$0xff] }
  0x53   :  { %942 = vmatpush1.bf16.msra.mxu1 %v941_v48  ;;  %v947_v63 = vpack.c.bf16 %v97_v57, %v95_v56  ;;  %v225_v56 = vld [vmem:[%s2391_s1 + $0x5f8] sm:$0xff]  ;;  %v1073_v58 = vpack.c.bf16 %v220_v52, %v218_v47  ;;  %v620_v47 = vld [vmem:[%s2393_s3 + $0x100] sm:$0xff] }
  0x54   :  { %944 = vmatprep.subr.bf16.mxu1 %v943_v51  ;;  %v1071_v51 = vpack.c.bf16 %v221_v44, %v219_v43  ;;  %v627_v52 = vld [vmem:[%s2393_s3 + $0x138] sm:$0xff] }
  0x55   :  { %1034 = vmatpush1.bf16.msra.mxu0 %v1033_v0  ;;  %v94_v0 = vld [vmem:[%s2391_s1 + $0x1e0] sm:$0xff] }
  0x56   :  { %1036 = vmatprep.subr.bf16.mxu0 %v1035_v5  ;;  %v591_v5 = vld [vmem:[%s2393_s3 + $0x18] sm:$0xff]  ;;  %v949_v8 = vpack.c.bf16 %v96_v1, %v94_v0  ;;  %v224_v0 = vld [vmem:[%s2391_s1 + $0x5f0] sm:$0xff]  ;;  %v609_v1 = vld [vmem:[%s2393_s3 + $0xa8] sm:$0xff] }
  0x57   :  { %946 = vmatpush1.bf16.msra.mxu1 %v945_v60  ;;  %v1143_v11 = vpack.c.bf16 %v591_v5, %v589_v4  ;;  %v229_v4 = vld [vmem:[%s2391_s1 + $0x618] sm:$0xff]  ;;  %v1077_v6 = vpack.c.bf16 %v224_v0, %v222_v59  ;;  %v624_v59 = vld [vmem:[%s2393_s3 + $0x120] sm:$0xff] }
  0x58   :  { %948 = vmatprep.subr.bf16.mxu1 %v947_v63  ;;  %v1075_v63 = vpack.c.bf16 %v225_v56, %v223_v55  ;;  %v1079_v10 = vpack.c.bf16 %v229_v4, %v227_v3  ;;  %v631_v0 = vld [vmem:[%s2393_s3 + $0x158] sm:$0xff] }
  0x59   :  { %1038 = vmatpush1.bf16.msra.mxu0 %v1037_v13  ;;  %v590_v13 = vld [vmem:[%s2393_s3 + $0x10] sm:$0xff] }
  0x5a   :  { %1040 = vmatprep.subr.bf16.mxu0 %v1039_v18  ;;  %v211_v18 = vld [vmem:[%s2391_s1 + $0x588] sm:$0xff]  ;;  %v1145_v21 = vpack.c.bf16 %v590_v13, %v588_v12  ;;  %v228_v12 = vld [vmem:[%s2391_s1 + $0x610] sm:$0xff] }
  0x5b   :  { %950 = vmatpush1.bf16.msra.mxu1 %v949_v8  ;;  %v1063_v27 = vpack.c.bf16 %v213_v19, %v211_v18  ;;  %v608_v8 = vld [vmem:[%s2393_s3 + $0xa0] sm:$0xff]  ;;  %v231_v13 = vld [vmem:[%s2391_s1 + $0x628] sm:$0xff] }
  0x5c   :  { %1144 = vmatprep.subr.bf16.mxu1 %v1143_v11  ;;  %v226_v11 = vld [vmem:[%s2391_s1 + $0x600] sm:$0xff] }
  0x5d   :  { %1042 = vmatpush1.bf16.msra.mxu0 %v1041_v25  ;;  %v592_v25 = vld [vmem:[%s2393_s3 + $0x20] sm:$0xff] }
  0x5e   :  { %1044 = vmatprep.subr.bf16.mxu0 %v1043_v30  ;;  %v599_v30 = vld [vmem:[%s2393_s3 + $0x58] sm:$0xff]  ;;  %367 = vmatmul.mubr.f32.vlgmr.msra.gmra.mrb[0].mxu1 %v26_v20  ;;  %v1149_v33 = vpack.c.bf16 %v594_v26, %v592_v25  ;;  %v230_v18 = vld [vmem:[%s2391_s1 + $0x620] sm:$0xff]  ;;  %v1081_v20 = vpack.c.bf16 %v228_v12, %v226_v11  ;;  %v1167_v26 = vpack.c.bf16 %v615_v16, %v613_v15  ;;  %v633_v11 = vld [vmem:[%s2393_s3 + $0x168] sm:$0xff] }
  0x5f   :  { %1146 = vmatpush1.bf16.msra.mxu1 %v1145_v21  ;;  %v1151_v36 = vpack.c.bf16 %v599_v30, %v597_v29  ;;  %v232_v21 = vld [vmem:[%s2391_s1 + $0x630] sm:$0xff]  ;;  %v33_v25 = vld [vmem:[%s2392_s0 + $0x38] sm:$0xff]  ;;  %v235_v29 = vld [vmem:[%s2391_s1 + $0x648] sm:$0xff] }
  0x60   :  { %1148 = vmatprep.subr.bf16.mxu1 %v1147_v24  ;;  %v237_v30 = vld [vmem:[%s2391_s1 + $0x658] sm:$0xff]  ;;  %v1085_v32 = vpack.c.bf16 %v232_v21, %v230_v18 }
  0x61   :  { %1046 = vmatpush1.bf16.msra.mxu0 %v1045_v37  ;;  %v596_v37 = vld [vmem:[%s2393_s3 + $0x40] sm:$0xff]  ;;  %v635_v12 = vld [vmem:[%s2393_s3 + $0x178] sm:$0xff] }
  0x62   :  { %1048 = vmatprep.subr.bf16.mxu0 %v1047_v42  ;;  %v603_v42 = vld [vmem:[%s2393_s3 + $0x78] sm:$0xff]  ;;  %v1153_v45 = vpack.c.bf16 %v598_v38, %v596_v37  ;;  %v1087_v37 = vpack.c.bf16 %v237_v30, %v235_v29  ;;  %v236_v38 = vld [vmem:[%s2391_s1 + $0x650] sm:$0xff]  ;;  %v1187_v18 = vpack.c.bf16 %v635_v12, %v633_v11  ;;  %v254_v29 = vld [vmem:[%s2391_s1 + $0x6e0] sm:$0xff] }
  0x63   :  { %1150 = vmatpush1.bf16.msra.mxu1 %v1149_v33  ;;  %v1155_v48 = vpack.c.bf16 %v603_v42, %v601_v41  ;;  %v234_v33 = vld [vmem:[%s2391_s1 + $0x640] sm:$0xff]  ;;  %v239_v41 = vld [vmem:[%s2391_s1 + $0x668] sm:$0xff]  ;;  %v241_v42 = vld [vmem:[%s2391_s1 + $0x678] sm:$0xff] }
  0x64   :  { %1152 = vmatprep.subr.bf16.mxu1 %v1151_v36  ;;  %v618_v36 = vld [vmem:[%s2393_s3 + $0xf0] sm:$0xff]  ;;  %v1089_v44 = vpack.c.bf16 %v236_v38, %v234_v33  ;;  %v261_v38 = vld [vmem:[%s2391_s1 + $0x718] sm:$0xff]  ;;  %v278_v12 = vld [vmem:[%s2391_s1 + $0x7a0] sm:$0xff] }
  0x65   :  { %1050 = vmatpush1.bf16.msra.mxu0 %v1049_v49  ;;  %v600_v49 = vld [vmem:[%s2393_s3 + $0x60] sm:$0xff]  ;;  %v1173_v43 = vpack.c.bf16 %v618_v36, %v616_v35  ;;  %v641_v35 = vld [vmem:[%s2393_s3 + $0x1a8] sm:$0xff]  ;;  %v643_v36 = vld [vmem:[%s2393_s3 + $0x1b8] sm:$0xff] }
  0x66   :  { %1052 = vmatprep.subr.bf16.mxu0 %v1051_v54  ;;  %v607_v54 = vld [vmem:[%s2393_s3 + $0x98] sm:$0xff]  ;;  %v1157_v57 = vpack.c.bf16 %v602_v50, %v600_v49  ;;  %v1091_v49 = vpack.c.bf16 %v241_v42, %v239_v41  ;;  %v240_v50 = vld [vmem:[%s2391_s1 + $0x670] sm:$0xff]  ;;  %v1195_v41 = vpack.c.bf16 %v643_v36, %v641_v35  ;;  %v640_v42 = vld [vmem:[%s2393_s3 + $0x1a0] sm:$0xff] }
  0x67   :  { %1154 = vmatpush1.bf16.msra.mxu1 %v1153_v45  ;;  %v1159_v60 = vpack.c.bf16 %v607_v54, %v605_v53  ;;  %v238_v45 = vld [vmem:[%s2391_s1 + $0x660] sm:$0xff]  ;;  %v243_v53 = vld [vmem:[%s2391_s1 + $0x688] sm:$0xff]  ;;  %v245_v54 = vld [vmem:[%s2391_s1 + $0x698] sm:$0xff] }
  0x68   :  { %1156 = vmatprep.subr.bf16.mxu1 %v1155_v48  ;;  %v622_v48 = vld [vmem:[%s2393_s3 + $0x110] sm:$0xff]  ;;  %v1093_v56 = vpack.c.bf16 %v240_v50, %v238_v45  ;;  %v258_v45 = vld [vmem:[%s2391_s1 + $0x700] sm:$0xff]  ;;  %v651_v35 = vld [vmem:[%s2393_s3 + $0x1f8] sm:$0xff] }
  0x69   :  { %1054 = vmatpush1.bf16.msra.mxu0 %v1053_v61  ;;  %v604_v61 = vld [vmem:[%s2393_s3 + $0x80] sm:$0xff]  ;;  %v1177_v55 = vpack.c.bf16 %v622_v48, %v620_v47  ;;  %v263_v47 = vld [vmem:[%s2391_s1 + $0x728] sm:$0xff]  ;;  %v265_v48 = vld [vmem:[%s2391_s1 + $0x738] sm:$0xff] }
  0x6a   :  { %1056 = vmatprep.subr.bf16.mxu0 %v1055_v2  ;;  %v611_v2 = vld [vmem:[%s2393_s3 + $0xb8] sm:$0xff]  ;;  %v1161_v5 = vpack.c.bf16 %v606_v62, %v604_v61  ;;  %v1095_v61 = vpack.c.bf16 %v245_v54, %v243_v53  ;;  %v244_v62 = vld [vmem:[%s2391_s1 + $0x690] sm:$0xff]  ;;  %v267_v54 = vld [vmem:[%s2391_s1 + $0x748] sm:$0xff] }
  0x6b   :  { %1158 = vmatpush1.bf16.msra.mxu1 %v1157_v57  ;;  %v1163_v7 = vpack.c.bf16 %v611_v2, %v609_v1  ;;  %v242_v57 = vld [vmem:[%s2391_s1 + $0x680] sm:$0xff]  ;;  %v247_v1 = vld [vmem:[%s2391_s1 + $0x6a8] sm:$0xff]  ;;  %v249_v2 = vld [vmem:[%s2391_s1 + $0x6b8] sm:$0xff] }
  0x6c   :  { %1160 = vmatprep.subr.bf16.mxu1 %v1159_v60  ;;  %v626_v60 = vld [vmem:[%s2393_s3 + $0x130] sm:$0xff]  ;;  %v1097_v4 = vpack.c.bf16 %v244_v62, %v242_v57 }
  0x6d   :  { %1058 = vmatpush1.bf16.msra.mxu0 %v1057_v9  ;;  %v610_v9 = vld [vmem:[%s2393_s3 + $0xb0] sm:$0xff]  ;;  %v1181_v3 = vpack.c.bf16 %v626_v60, %v624_v59  ;;  %v271_v60 = vld [vmem:[%s2391_s1 + $0x768] sm:$0xff] }
  0x6e   :  { %1060 = vmatprep.subr.bf16.mxu0 %v1059_v14  ;;  %v233_v14 = vld [vmem:[%s2391_s1 + $0x638] sm:$0xff]  ;;  %v1165_v19 = vpack.c.bf16 %v610_v9, %v608_v8  ;;  %v630_v8 = vld [vmem:[%s2393_s3 + $0x150] sm:$0xff]  ;;  %v1099_v9 = vpack.c.bf16 %v249_v2, %v247_v1  ;;  %v275_v2 = vld [vmem:[%s2391_s1 + $0x788] sm:$0xff] }
  0x6f   :  { %1162 = vmatpush1.bf16.msra.mxu1 %v1161_v5  ;;  %v1083_v24 = vpack.c.bf16 %v233_v14, %v231_v13  ;;  %v246_v5 = vld [vmem:[%s2391_s1 + $0x6a0] sm:$0xff]  ;;  %v251_v13 = vld [vmem:[%s2391_s1 + $0x6c8] sm:$0xff]  ;;  %v253_v14 = vld [vmem:[%s2391_s1 + $0x6d8] sm:$0xff] }
  0x70   :  { %1164 = vmatprep.subr.bf16.mxu1 %v1163_v7  ;;  %v628_v7 = vld [vmem:[%s2393_s3 + $0x140] sm:$0xff]  ;;  %v1103_v21 = vpack.c.bf16 %v253_v14, %v251_v13  ;;  %v264_v53 = vld [vmem:[%s2391_s1 + $0x730] sm:$0xff]  ;;  %v283_v14 = vld [vmem:[%s2391_s1 + $0x7c8] sm:$0xff] }
  0x71   :  { %1062 = vmatpush1.bf16.msra.mxu0 %v1061_v22  ;;  %v612_v22 = vld [vmem:[%s2393_s3 + $0xc0] sm:$0xff]  ;;  %v1185_v15 = vpack.c.bf16 %v630_v8, %v628_v7  ;;  %v268_v59 = vld [vmem:[%s2391_s1 + $0x750] sm:$0xff]  ;;  %v279_v8 = vld [vmem:[%s2391_s1 + $0x7a8] sm:$0xff] }
  0x72   :  { %1064 = vmatprep.subr.bf16.mxu0 %v1063_v27  ;;  %v617_v27 = vld [vmem:[%s2393_s3 + $0xe8] sm:$0xff]  ;;  %v1169_v31 = vpack.c.bf16 %v614_v23, %v612_v22  ;;  %v252_v22 = vld [vmem:[%s2391_s1 + $0x6d0] sm:$0xff] }
  0x73   :  { %1166 = vmatpush1.bf16.msra.mxu1 %v1165_v19  ;;  %v632_v19 = vld [vmem:[%s2393_s3 + $0x160] sm:$0xff]  ;;  %v637_v23 = vld [vmem:[%s2393_s3 + $0x188] sm:$0xff]  ;;  %v272_v1 = vld [vmem:[%s2391_s1 + $0x770] sm:$0xff] }
  0x74   :  { %1168 = vmatprep.subr.bf16.mxu1 %v1167_v26  ;;  %v257_v26 = vld [vmem:[%s2391_s1 + $0x6f8] sm:$0xff]  ;;  %v276_v7 = vld [vmem:[%s2391_s1 + $0x790] sm:$0xff] }
  0x75   :  { %1066 = vmatpush1.bf16.msra.mxu0 %v1065_v34  ;;  %v1171_v34 = vpack.c.bf16 %v619_v28, %v617_v27  ;;  %v280_v13 = vld [vmem:[%s2391_s1 + $0x7b0] sm:$0xff] }
  0x76   :  { %1068 = vmatprep.subr.bf16.mxu0 %v1067_v39  ;;  %v621_v39 = vld [vmem:[%s2393_s3 + $0x108] sm:$0xff] }
  0x77   :  { %1170 = vmatpush1.bf16.msra.mxu1 %v1169_v31  ;;  %v636_v31 = vld [vmem:[%s2393_s3 + $0x180] sm:$0xff] }
  0x78   :  { %1172 = vmatprep.subr.bf16.mxu1 %v1171_v34  ;;  %v256_v34 = vld [vmem:[%s2391_s1 + $0x6f0] sm:$0xff] }
  0x79   :  { %1070 = vmatpush1.bf16.msra.mxu0 %v1069_v46  ;;  %v1175_v46 = vpack.c.bf16 %v623_v40, %v621_v39  ;;  %v1109_v40 = vpack.c.bf16 %v256_v34, %v254_v29  ;;  %v647_v29 = vld [vmem:[%s2393_s3 + $0x1d8] sm:$0xff]  ;;  %v649_v34 = vld [vmem:[%s2393_s3 + $0x1e8] sm:$0xff] }
  0x7a   :  { %1072 = vmatprep.subr.bf16.mxu0 %v1071_v51  ;;  %v625_v51 = vld [vmem:[%s2393_s3 + $0x128] sm:$0xff]  ;;  %v1203_v36 = vpack.c.bf16 %v651_v35, %v649_v34  ;;  %v767_v35 = vld [vmem:[%s2394_s5 + $0xf0] sm:$0xff] }
  0x7b   :  { %1174 = vmatpush1.bf16.msra.mxu1 %v1173_v43  ;;  %v642_v43 = vld [vmem:[%s2393_s3 + $0x1b0] sm:$0xff] }
  0x7c   :  { %1176 = vmatprep.subr.bf16.mxu1 %v1175_v46  ;;  %v260_v46 = vld [vmem:[%s2391_s1 + $0x710] sm:$0xff] }
  0x7d   :  { %1074 = vmatpush1.bf16.msra.mxu0 %v1073_v58  ;;  %v1179_v58 = vpack.c.bf16 %v627_v52, %v625_v51  ;;  %v1113_v50 = vpack.c.bf16 %v260_v46, %v258_v45  ;;  %v1115_v51 = vpack.c.bf16 %v265_v48, %v263_v47  ;;  %v262_v52 = vld [vmem:[%s2391_s1 + $0x720] sm:$0xff]  ;;  %v292_v45 = vlaneseq }
  0x7e   :  { %1076 = vmatprep.subr.bf16.mxu0 %v1075_v63  ;;  %v629_v63 = vld [vmem:[%s2393_s3 + $0x148] sm:$0xff]  ;;  %v290_v48 = vld [vmem:[%s2395_s2] sm:$0x3] }
  0x7f   :  { %1178 = vmatpush1.bf16.msra.mxu1 %v1177_v55  ;;  %v269_v55 = vld [vmem:[%s2391_s1 + $0x758] sm:$0xff]  ;;  %v2277_v46 = vshrl.u32 %v292_v45, 7 }
  0x80   :  { %1180 = vmatprep.subr.bf16.mxu1 %v1179_v58  ;;  %v1119_v57 = vpack.c.bf16 %v269_v55, %v267_v54  ;;  %v266_v58 = vld [vmem:[%s2391_s1 + $0x740] sm:$0xff] }
  0x81   :  { %1078 = vmatpush1.bf16.msra.mxu0 %v1077_v6  ;;  %v1183_v6 = vpack.c.bf16 %v631_v0, %v629_v63  ;;  %v1121_v62 = vpack.c.bf16 %v268_v59, %v266_v58  ;;  %v270_v0 = vld [vmem:[%s2391_s1 + $0x760] sm:$0xff]  ;;  %v294_v47 = vsub.s32 0, %v2277_v46  ;;  %v738_v58 = vld [vmem:[%s2394_s5 + $0x8] sm:$0xff] }
  0x82   :  { %1080 = vmatprep.subr.bf16.mxu0 %v1079_v10  ;;  %v248_v10 = vld [vmem:[%s2391_s1 + $0x6b0] sm:$0xff] }
  0x83   :  { %1182 = vmatpush1.bf16.msra.mxu1 %v1181_v3  ;;  %v1101_v16 = vpack.c.bf16 %v248_v10, %v246_v5  ;;  %v277_v3 = vld [vmem:[%s2391_s1 + $0x798] sm:$0xff] }
  0x84   :  { %509 = vmatmul.mubr.f32.vlgmr.msra.gmra.mrb[0].mxu0 %v30_v17  ;;  %v250_v17 = vld [vmem:[%s2391_s1 + $0x6c0] sm:$0xff]  ;;  %1184 = vmatprep.subr.bf16.mxu1 %v1183_v6  ;;  %v1127_v5 = vpack.c.bf16 %v277_v3, %v275_v2  ;;  %v739_v2 = vld [vmem:[%s2394_s5 + $0x10] sm:$0xff]  ;;  %v740_v3 = vld [vmem:[%s2394_s5 + $0x18] sm:$0xff] }
  0x85   :  { %1082 = vmatpush1.bf16.msra.mxu0 %v1081_v20  ;;  %579 = vmatprep.mubr.f32.mxu0 %v33_v25  ;;  %v634_v20 = vld [vmem:[%s2393_s3 + $0x170] sm:$0xff]  ;;  %v255_v25 = vld [vmem:[%s2391_s1 + $0x6e8] sm:$0xff]  ;;  %v1105_v28 = vpack.c.bf16 %v252_v22, %v250_v17  ;;  %v274_v6 = vld [vmem:[%s2391_s1 + $0x780] sm:$0xff] }
  0x86   :  { %1084 = vmatprep.subr.bf16.mxu0 %v1083_v24  ;;  %v639_v24 = vld [vmem:[%s2393_s3 + $0x198] sm:$0xff]  ;;  %v1189_v27 = vpack.c.bf16 %v634_v20, %v632_v19  ;;  %v1107_v33 = vpack.c.bf16 %v257_v26, %v255_v25  ;;  %v1129_v10 = vpack.c.bf16 %v276_v7, %v274_v6  ;;  %v284_v19 = vld [vmem:[%s2391_s1 + $0x7d0] sm:$0xff]  ;;  %v287_v20 = vld [vmem:[%s2391_s1 + $0x7e8] sm:$0xff]  ;;  %v1213_v6 = vpack.c.bf16 %v740_v3, %v739_v2 }
  0x87   :  { %1186 = vmatpush1.bf16.msra.mxu1 %v1185_v15  ;;  %v1191_v30 = vpack.c.bf16 %v639_v24, %v637_v23  ;;  %v285_v15 = vld [vmem:[%s2391_s1 + $0x7d8] sm:$0xff]  ;;  %v286_v24 = vld [vmem:[%s2391_s1 + $0x7e0] sm:$0xff]  ;;  %v288_v25 = vld [vmem:[%s2391_s1 + $0x7f0] sm:$0xff] }
  0x88   :  { %1188 = vmatprep.subr.bf16.mxu1 %v1187_v18  ;;  %v1135_v17 = vpack.c.bf16 %v285_v15, %v283_v14  ;;  %v282_v18 = vld [vmem:[%s2391_s1 + $0x7c0] sm:$0xff]  ;;  %v1141_v26 = vpack.c.bf16 %v288_v25, %v286_v24  ;;  %v743_v14 = vld [vmem:[%s2394_s5 + $0x30] sm:$0xff]  ;;  %v744_v15 = vld [vmem:[%s2394_s5 + $0x38] sm:$0xff] }
  0x89   :  { %1086 = vmatpush1.bf16.msra.mxu0 %v1085_v32  ;;  %v638_v32 = vld [vmem:[%s2393_s3 + $0x190] sm:$0xff]  ;;  %v1137_v22 = vpack.c.bf16 %v284_v19, %v282_v18  ;;  %v1221_v18 = vpack.c.bf16 %v744_v15, %v743_v14 }
  0x8a   :  { %1088 = vmatprep.subr.bf16.mxu0 %v1087_v37  ;;  %v259_v37 = vld [vmem:[%s2391_s1 + $0x708] sm:$0xff]  ;;  %v1193_v39 = vpack.c.bf16 %v638_v32, %v636_v31  ;;  %v644_v31 = vld [vmem:[%s2393_s3 + $0x1c0] sm:$0xff]  ;;  %v646_v32 = vld [vmem:[%s2393_s3 + $0x1d0] sm:$0xff] }
  0x8b   :  { %1190 = vmatpush1.bf16.msra.mxu1 %v1189_v27  ;;  %v32_v27 = vld [vmem:[%s2392_s0 + $0x30] sm:$0xff] }
  0x8c   :  { %1192 = vmatprep.subr.bf16.mxu1 %v1191_v30 }
  0x8d   :  { %1090 = vmatpush1.bf16.msra.mxu0 %v1089_v44  ;;  %v1111_v44 = vpack.c.bf16 %v261_v38, %v259_v37  ;;  %v648_v37 = vld [vmem:[%s2393_s3 + $0x1e0] sm:$0xff]  ;;  %v650_v38 = vld [vmem:[%s2393_s3 + $0x1f0] sm:$0xff] }
  0x8e   :  { %1092 = vmatprep.subr.bf16.mxu0 %v1091_v49  ;;  %v1197_v49 = vpack.c.bf16 %v642_v43, %v640_v42 }
  0x8f   :  { %1194 = vmatpush1.bf16.msra.mxu1 %v1193_v39  ;;  %v1205_v39 = vpack.c.bf16 %v650_v38, %v648_v37  ;;  %v751_v38 = vld [vmem:[%s2394_s5 + $0x70] sm:$0xff] }
  0x90   :  { %1196 = vmatprep.subr.bf16.mxu1 %v1195_v41  ;;  %v754_v41 = vld [vmem:[%s2394_s5 + $0x88] sm:$0xff] }
  0x91   :  { %1094 = vmatpush1.bf16.msra.mxu0 %v1093_v56  ;;  %v1117_v56 = vpack.c.bf16 %v264_v53, %v262_v52 }
  0x92   :  { %1096 = vmatprep.subr.bf16.mxu0 %v1095_v61  ;;  %v273_v61 = vld [vmem:[%s2391_s1 + $0x778] sm:$0xff] }
  0x93   :  { %1198 = vmatpush1.bf16.msra.mxu1 %v1197_v49  ;;  %v1123_v63 = vpack.c.bf16 %v273_v61, %v271_v60  ;;  %v298_v49 = vsub.s32 1, %v2277_v46  ;;  %v755_v60 = vld [vmem:[%s2394_s5 + $0x90] sm:$0xff]  ;;  %v756_v61 = vld [vmem:[%s2394_s5 + $0x98] sm:$0xff] }
  0x95   :  { %1098 = vmatpush1.bf16.msra.mxu0 %v1097_v4  ;;  %v1125_v4 = vpack.c.bf16 %v272_v1, %v270_v0  ;;  %v1211_v1 = vpack.c.bf16 %v756_v61, %v755_v60 }
  0x96   :  { %1100 = vmatprep.subr.bf16.mxu0 %v1099_v9  ;;  %v281_v9 = vld [vmem:[%s2391_s1 + $0x7b8] sm:$0xff] }
  0x97   :  { %v1131_v11 = vpack.c.bf16 %v281_v9, %v279_v8  ;;  %v741_v8 = vld [vmem:[%s2394_s5 + $0x20] sm:$0xff]  ;;  %v742_v9 = vld [vmem:[%s2394_s5 + $0x28] sm:$0xff] }
  0x99   :  { %1102 = vmatpush1.bf16.msra.mxu0 %v1101_v16  ;;  %v1133_v16 = vpack.c.bf16 %v280_v13, %v278_v12  ;;  %v1217_v12 = vpack.c.bf16 %v742_v9, %v741_v8 }
  0x9a   :  { %1104 = vmatprep.subr.bf16.mxu0 %v1103_v21  ;;  %v289_v21 = vld [vmem:[%s2391_s1 + $0x7f8] sm:$0xff] }
  0x9b   :  { %v1139_v23 = vpack.c.bf16 %v289_v21, %v287_v20  ;;  %v745_v20 = vld [vmem:[%s2394_s5 + $0x40] sm:$0xff]  ;;  %v746_v21 = vld [vmem:[%s2394_s5 + $0x48] sm:$0xff] }
  0x9c   :  { %v1225_v24 = vpack.c.bf16 %v746_v21, %v745_v20 }
  0x9d   :  { %1106 = vmatpush1.bf16.msra.mxu0 %v1105_v28  ;;  %v645_v28 = vld [vmem:[%s2393_s3 + $0x1c8] sm:$0xff] }
  0x9e   :  { %1108 = vmatprep.subr.bf16.mxu0 %v1107_v33  ;;  %v1199_v30 = vpack.c.bf16 %v647_v29, %v645_v28  ;;  %v1201_v33 = vpack.c.bf16 %v646_v32, %v644_v31  ;;  %v765_v28 = vld [vmem:[%s2394_s5 + $0xe0] sm:$0xff]  ;;  %v766_v29 = vld [vmem:[%s2394_s5 + $0xe8] sm:$0xff] }
  0x9f   :  { %v1231_v31 = vpack.c.bf16 %v766_v29, %v765_v28  ;;  %v749_v32 = vld [vmem:[%s2394_s5 + $0x60] sm:$0xff] }
  0xa0   :  { %1200 = vmatprep.subr.bf16.mxu1 %v1199_v30 }
  0xa1   :  { %1110 = vmatpush1.bf16.msra.mxu0 %v1109_v40  ;;  %1202 = vmatpush1.bf16.msra.mxu1 %v1201_v33  ;;  %v753_v40 = vld [vmem:[%s2394_s5 + $0x80] sm:$0xff]  ;;  %v750_v33 = vld [vmem:[%s2394_s5 + $0x68] sm:$0xff] }
  0xa2   :  { %1112 = vmatprep.subr.bf16.mxu0 %v1111_v44  ;;  %1204 = vmatprep.subr.bf16.mxu1 %v1203_v36  ;;  %v1207_v42 = vpack.c.bf16 %v754_v41, %v753_v40  ;;  %v1233_v34 = vpack.c.bf16 %v750_v33, %v749_v32  ;;  %v768_v36 = vld [vmem:[%s2394_s5 + $0xf8] sm:$0xff]  ;;  %v652_v41 = vld [vmem:[%s2396_s4] sm:$0x3] }
  0xa3   :  { %v1235_v37 = vpack.c.bf16 %v768_v36, %v767_v35 }
  0xa5   :  { %1114 = vmatpush1.bf16.msra.mxu0 %v1113_v50  ;;  %1206 = vmatpush1.bf16.msra.mxu1 %v1205_v39  ;;  %v295_v50 = vrot.slane %v290_v48, %v294_v47  ;;  %v752_v39 = vld [vmem:[%s2394_s5 + $0x78] sm:$0xff] }
  0xa6   :  { %1116 = vmatprep.subr.bf16.mxu0 %v1115_v51  ;;  %1208 = vmatprep.subr.bf16.mxu1 %v1207_v42  ;;  %v299_v51 = vrot.slane %v290_v48, %v298_v49  ;;  %v1237_v40 = vpack.c.bf16 %v752_v39, %v751_v38  ;;  %v657_v42 = vrot.slane %v652_v41, %v294_v47 }
  0xa9   :  { %1118 = vmatpush1.bf16.msra.mxu0 %v1117_v56 }
  0xaa   :  { %1120 = vmatprep.subr.bf16.mxu0 %v1119_v57  ;;  %v737_v57 = vld [vmem:[%s2394_s5] sm:$0xff] }
  0xad   :  { %1122 = vmatpush1.bf16.msra.mxu0 %v1121_v62 }
  0xae   :  { %1124 = vmatprep.subr.bf16.mxu0 %v1123_v63  ;;  %v1209_v63 = vpack.c.bf16 %v738_v58, %v737_v57 }
  0xb1   :  { %1126 = vmatpush1.bf16.msra.mxu0 %v1125_v4  ;;  %v757_v4 = vld [vmem:[%s2394_s5 + $0xa0] sm:$0xff] }
  0xb2   :  { %1128 = vmatprep.subr.bf16.mxu0 %v1127_v5  ;;  %v758_v5 = vld [vmem:[%s2394_s5 + $0xa8] sm:$0xff] }
  0xb3   :  { %v1215_v7 = vpack.c.bf16 %v758_v5, %v757_v4 }
  0xb5   :  { %1130 = vmatpush1.bf16.msra.mxu0 %v1129_v10  ;;  %v759_v10 = vld [vmem:[%s2394_s5 + $0xb0] sm:$0xff] }
  0xb6   :  { %1132 = vmatprep.subr.bf16.mxu0 %v1131_v11  ;;  %v760_v11 = vld [vmem:[%s2394_s5 + $0xb8] sm:$0xff] }
  0xb7   :  { %v1219_v13 = vpack.c.bf16 %v760_v11, %v759_v10 }
  0xb9   :  { %1134 = vmatpush1.bf16.msra.mxu0 %v1133_v16  ;;  %v761_v16 = vld [vmem:[%s2394_s5 + $0xc0] sm:$0xff] }
  0xba   :  { %1136 = vmatprep.subr.bf16.mxu0 %v1135_v17  ;;  %v762_v17 = vld [vmem:[%s2394_s5 + $0xc8] sm:$0xff] }
  0xbb   :  { %v1223_v19 = vpack.c.bf16 %v762_v17, %v761_v16 }
  0xbd   :  { %1138 = vmatpush1.bf16.msra.mxu0 %v1137_v22  ;;  %v763_v22 = vld [vmem:[%s2394_s5 + $0xd0] sm:$0xff] }
  0xbe   :  { %1140 = vmatprep.subr.bf16.mxu0 %v1139_v23  ;;  %v764_v23 = vld [vmem:[%s2394_s5 + $0xd8] sm:$0xff] }
  0xbf   :  { %v1227_v25 = vpack.c.bf16 %v764_v23, %v763_v22 }
  0xc1   :  { %1142 = vmatpush1.bf16.msra.mxu0 %v1141_v26  ;;  %v747_v26 = vld [vmem:[%s2394_s5 + $0x50] sm:$0xff] }
  0xc4   :  { %580 = vmatmul.mubr.f32.vlgmr.msra.gmra.mrb[0].mxu0 %v32_v27  ;;  %v748_v27 = vld [vmem:[%s2394_s5 + $0x58] sm:$0xff] }
  0xc5   :  { %v1229_v30 = vpack.c.bf16 %v748_v27, %v747_v26 }
 0x131   :  { %v368_v43 = vpop.f32.mrb[0].mxu1 }
 0x132   :  { %v370_v44 = vpop.f32.mrb[1].mxu1  ;;  %v369_v52 = vadd.f32 %v368_v43, %v295_v50  ;;  %v661_v43 = vrot.slane %v652_v41, %v298_v49 }
 0x133   :  { %v371_v53 = vadd.f32 %v370_v44, %v299_v51 }
 0x197   :  { %v581_v54 = vpop.f32.mrb[0].mxu0 }
 0x198   :  { %v1240_v55 = vadd.f32 %v581_v54, %v369_v52  ;;  %v583_v56 = vpop.f32.mrb[1].mxu0  ;;  %v851_v54 = vld [vmem:[%s2397_s6] ss:$0 sm:$0xff] }
 0x199   :  { %v1242_v59 = vadd.f32 %v583_v56, %v371_v53 }
 0x19a   :  { %v586_v0 = vmax.f32 %v1240_v55, 0.0 }
 0x19b   :  { %v587_v62 = vmax.f32 %v1242_v59, 0.0 }
 0x19d   :  { %728 = vmatprep.mubr.f32.mxu1 %v587_v62 }
 0x19e   :  { %729 = vmatmul.mubr.f32.vlgmr.msra.gmra.mrb[2].mxu1 %v586_v0 }
 0x19f   :  { %1210 = vmatpush3.bf16.msra.mxu1 %v1209_v63 }
 0x1a0   :  { %1212 = vmatprep.subr.bf16.mxu1 %v1211_v1 }
 0x1a3   :  { %1214 = vmatpush3.bf16.msra.mxu1 %v1213_v6 }
 0x1a4   :  { %1216 = vmatprep.subr.bf16.mxu1 %v1215_v7 }
 0x1a7   :  { %1218 = vmatpush3.bf16.msra.mxu1 %v1217_v12 }
 0x1a8   :  { %1220 = vmatprep.subr.bf16.mxu1 %v1219_v13 }
 0x1ab   :  { %1222 = vmatpush3.bf16.msra.mxu1 %v1221_v18 }
 0x1ac   :  { %1224 = vmatprep.subr.bf16.mxu1 %v1223_v19 }
 0x1af   :  { %1226 = vmatpush3.bf16.msra.mxu1 %v1225_v24 }
 0x1b0   :  { %1228 = vmatprep.subr.bf16.mxu1 %v1227_v25 }
 0x1b3   :  { %1230 = vmatpush3.bf16.msra.mxu1 %v1229_v30 }
 0x1b4   :  { %1232 = vmatprep.subr.bf16.mxu1 %v1231_v31 }
 0x1b7   :  { %1234 = vmatpush3.bf16.msra.mxu1 %v1233_v34 }
 0x1b8   :  { %1236 = vmatprep.subr.bf16.mxu1 %v1235_v37 }
 0x1bb   :  { %1238 = vmatpush3.bf16.msra.mxu1 %v1237_v40 }
 0x271   :  { %v730_v44 = vpop.f32.mrb[2].mxu1 }
 0x272   :  { %v731_v45 = vadd.f32 %v730_v44, %v657_v42  ;;  %v732_v48 = vpop.f32.mrb[3].mxu1 }
 0x273   :  { %v733_v50 = vadd.f32 %v732_v48, %v661_v43 }
 0x274   :  { %v735_v52 = vmax.f32 %v731_v45, 0.0 }
 0x275   :  { %v736_v51 = vmax.f32 %v733_v50, 0.0 }
 0x277   :  { %840 = vmatprep.mubr.f32.mxu1 %v736_v51 }
 0x278   :  { %841 = vmatmul.mubr.f32.vlgmr.msra.gmra.mrb[4].mxu1 %v735_v52 }
 0x34b   :  { %v884_v53 = vpop.f32.mrb[4].mxu1 }
 0x34c   :  { %v885_v55 = vpop.f32.mrb[5].mxu1 }
 0x34d   :  { %v886_v56 = vadd.f32 %v885_v55, %v884_v53 }
 0x34f   :  { %v843_v57 = vadd.f32 %v886_v56, %v851_v54 }
 0x351   :  { %846 = vst [vmem:[%s2398_s7] sm:$0xff] %v843_v57 }

</bundles_post_ra>
